<compile_context>
chip_gen: v7x
topology: tpu7x:2x2x1
jax: 0.10.0
libtpu: 0.0.40
codegen_flags: <defaults>
</compile_context>

<pallas_src>
import functools

import jax
import jax.numpy as jnp
from jax import lax
from jax.experimental import pallas as pl
from jax.experimental.pallas import tpu as pltpu

OBS_DIM = 27
HID = 32
TB_MAX = 4096  # max batch tile on the lane axis (multiple of 128); sweep {2048,4096,8192}


def _mlp_kernel(x_ref, w1_ref, b1_ref, w2_ref, b2_ref, w3_ref, b3_ref, o_ref,
                *, compute_dtype):
    # x_ref: (tb, OBS_DIM) block of the state in its native (B, 27) layout.
    # Weights use the PyTorch nn.Linear layout (out_features, in_features).
    # All matmuls accumulate in f32; bias adds + tanh stay f32 on VPU/EUP.
    x = x_ref[...].astype(compute_dtype)                               # (tb, 27)

    # Layer 1: contract the feature axis of both operands ('od,bd->ob') so the result
    # is (32, tb) with batch on lanes.  Any on-chip tile transpose Mosaic inserts for
    # the transposed contraction is hidden under the input DMA.
    h1 = jnp.tanh(
        lax.dot_general(
            w1_ref[...], x,
            dimension_numbers=(((1,), (1,)), ((), ())),
            preferred_element_type=jnp.float32,
        ) + b1_ref[...]
    )                                                                  # (32, tb) f32

    # Layer 2: plain MXU matmul, batch stays on lanes.
    h2 = jnp.tanh(
        jnp.dot(w2_ref[...], h1.astype(w2_ref.dtype),
                preferred_element_type=jnp.float32) + b2_ref[...]
    )                                                                  # (32, tb) f32
    # NOTE: if a bundle dump ever shows EUP as the binding unit (possible on v7x after
    # the HBM fixes, or on v5e), swap jnp.tanh for a VPU polynomial; otherwise leave it.

    # Layer 3 (32 -> 1): VPU multiply + XLU sublane reduce -> lane-dense (1, tb) row.
    out = jnp.sum(h2 * w3_ref[...], axis=0, keepdims=True) + b3_ref[0]  # (1, tb) f32
    o_ref[...] = out.astype(o_ref.dtype)


def _pick_tb(batch, tb_max=TB_MAX):
    """Lane-dense batch tile: multiple of 128, clamped for small batches, capped so
    large batches produce >= 2 programs (both v7x TensorCores get work; on v5e/v6e
    with 1 TC bigger tiles are simply better)."""
    half = -(-batch // 2)                  # cdiv(batch, 2)
    tb = -(-half // 128) * 128             # round up to a lane multiple
    return int(max(128, min(tb_max, tb)))


def ppo_value_forward(state, params, *, compute_dtype=jnp.float32, tb_max=TB_MAX):
    """state: (B, 27) -> (B, 1) float32 predicted values.

    params use the PyTorch nn.Linear layout: weight (out, in), bias (out,).
    compute_dtype=jnp.bfloat16 runs the MXU matmuls with bf16 operands and f32
    accumulation -- valid and recommended on v5e, v6e and v7x (bias/tanh stay f32).
    For the full bandwidth win on this memory-bound kernel, store `state` as bf16
    upstream; the kernel accepts either dtype and casts in-kernel.
    """
    w1, b1, w2, b2, w3, b3 = params
    B = state.shape[0]
    tb = _pick_tb(B, tb_max)
    num_tiles = pl.cdiv(B, tb)
    Bp = num_tiles * tb                    # padding only in the tiny (1, Bp) output

    # Only sub-one-tile latency batches need a row pad; for B >= 128 the state is read
    # directly from its native layout and the last block is simply a ragged boundary.
    state_in = state if B >= tb else jnp.pad(state, ((0, tb - B), (0, 0)))

    # Matmul operands in compute dtype; biases / final projection stay f32.
    w1c = w1.astype(compute_dtype)                      # (32, 27)
    w2c = w2.astype(compute_dtype)                      # (32, 32)
    b1c = b1.reshape(HID, 1).astype(jnp.float32)        # (32, 1)
    b2c = b2.reshape(HID, 1).astype(jnp.float32)        # (32, 1)
    w3c = w3.reshape(HID, 1).astype(jnp.float32)        # (32, 1)
    b3c = b3.reshape(1).astype(jnp.float32)             # (1,) scalar -> SMEM

    def rep(shape):  # replicated (block == full array) parameter in VMEM
        return pl.BlockSpec(shape, lambda i: (0, 0))

    out = pl.pallas_call(
        functools.partial(_mlp_kernel, compute_dtype=compute_dtype),
        out_shape=jax.ShapeDtypeStruct((1, Bp), jnp.float32),
        grid=(num_tiles,),
        in_specs=[
            pl.BlockSpec((tb, OBS_DIM), lambda i: (i, 0)),        # state rows, native layout
            rep((HID, OBS_DIM)),
            rep((HID, 1)),
            rep((HID, HID)),
            rep((HID, 1)),
            rep((HID, 1)),
            pl.BlockSpec(memory_space=pltpu.MemorySpace.SMEM),    # b3 scalar in SMEM
        ],
        out_specs=pl.BlockSpec((1, tb), lambda i: (0, i)),        # lane-dense output row
        compiler_params=pltpu.CompilerParams(
            dimension_semantics=("parallel",),
        ),
    )(state_in, w1c, b1c, w2c, b2c, w3c, b3c)

    # Back to the PyTorch convention: (B, 1) column of values.
    return out[0, :B].reshape(B, 1)


def init_params(key):
    """Deterministic init matching PyTorch nn.Linear: weight (out, in), bias (out,)."""
    ks = jax.random.split(key, 6)

    def linear(kw, kb, fan_in, fan_out):
        bound = 1.0 / jnp.sqrt(fan_in)
        w = jax.random.uniform(kw, (fan_out, fan_in), jnp.float32, -bound, bound)
        b = jax.random.uniform(kb, (fan_out,), jnp.float32, -bound, bound)
        return w, b

    w1, b1 = linear(ks[0], ks[1], OBS_DIM, HID)
    w2, b2 = linear(ks[2], ks[3], HID, HID)
    w3, b3 = linear(ks[4], ks[5], HID, 1)
    return (w1, b1, w2, b2, w3, b3)


def ppo_value_reference(state, params):
    w1, b1, w2, b2, w3, b3 = params
    h1 = jnp.tanh(state @ w1.T + b1)
    h2 = jnp.tanh(h1 @ w2.T + b2)
    return h2 @ w3.T + b3


if __name__ == "__main__":
    key = jax.random.PRNGKey(0)
    kp, kx = jax.random.split(key)
    params = init_params(kp)

    # Small demo batch: 8 states with observation_space = 27.
    state = jax.random.normal(kx, (8, OBS_DIM), jnp.float32)
    ref = ppo_value_reference(state, params)

    # f32 MXU path: near-exact match with the pure-JAX reference.
    out = ppo_value_forward(state, params)
    out = jax.block_until_ready(out)
    assert out.shape == (8, 1)
    assert jnp.allclose(out, ref, atol=1e-5, rtol=1e-5)

    # bf16 MXU operands (recommended on v5e/v6e/v7x): same kernel, looser tolerance.
    out_bf16 = ppo_value_forward(state, params, compute_dtype=jnp.bfloat16)
    out_bf16 = jax.block_until_ready(out_bf16)
    assert out_bf16.shape == (8, 1)
    assert jnp.allclose(out_bf16, ref, atol=5e-2, rtol=5e-2)

    # Ragged multi-tile path: exercises boundary-block clipping and grid > 1.
    state_big = jax.random.normal(kx, (300, OBS_DIM), jnp.float32)
    ref_big = ppo_value_reference(state_big, params)
    out_big = jax.block_until_ready(ppo_value_forward(state_big, params))
    assert out_big.shape == (300, 1)
    assert jnp.allclose(out_big, ref_big, atol=1e-5, rtol=1e-5)

    print("KERNEL_OK")
</pallas_src>

<mosaic_0001>
module attributes {stable_mosaic.version = 11 : i64} {
  func.func @_mlp_kernel(%arg0: i32, %arg1: memref<128x27xf32, #tpu.memory_space<vmem>>, %arg2: memref<32x27xf32, #tpu.memory_space<vmem>>, %arg3: memref<32x1xf32, #tpu.memory_space<vmem>>, %arg4: memref<32x32xf32, #tpu.memory_space<vmem>>, %arg5: memref<32x1xf32, #tpu.memory_space<vmem>>, %arg6: memref<32x1xf32, #tpu.memory_space<vmem>>, %arg7: memref<1xf32, #tpu.memory_space<smem>>, %arg8: memref<1x128xf32, #tpu.memory_space<vmem>>) attributes {dimension_semantics = [#tpu.dimension_semantics<parallel>], iteration_bounds = array<i64: 1>, scalar_prefetch = 0 : i64, scratch_operands = 0 : i64, tpu.core_type = #tpu.core_type<tc>, window_params = [{transform_indices = @transform_0, window_bounds = array<i64: 128, 27>}, {pipeline_mode = #tpu.pipeline_mode<synchronous>, transform_indices = @transform_1, window_bounds = array<i64: 32, 27>}, {pipeline_mode = #tpu.pipeline_mode<synchronous>, transform_indices = @transform_2, window_bounds = array<i64: 32, 1>}, {pipeline_mode = #tpu.pipeline_mode<synchronous>, transform_indices = @transform_3, window_bounds = array<i64: 32, 32>}, {pipeline_mode = #tpu.pipeline_mode<synchronous>, transform_indices = @transform_4, window_bounds = array<i64: 32, 1>}, {pipeline_mode = #tpu.pipeline_mode<synchronous>, transform_indices = @transform_5, window_bounds = array<i64: 32, 1>}, {transform_indices = @transform_6, window_bounds = array<i64: 1>}, {transform_indices = @transform_7, window_bounds = array<i64: 1, 128>}]} {
    %c0 = arith.constant 0 : index
    %c0_0 = arith.constant 0 : index
    %0 = vector.load %arg1[%c0, %c0_0] : memref<128x27xf32, #tpu.memory_space<vmem>>, vector<128x27xf32>
    %c0_1 = arith.constant 0 : index
    %c0_2 = arith.constant 0 : index
    %1 = vector.load %arg2[%c0_1, %c0_2] : memref<32x27xf32, #tpu.memory_space<vmem>>, vector<32x27xf32>
    %cst = arith.constant dense<0.000000e+00> : vector<32x128xf32>
    %2 = tpu.matmul %1, %0, %cst {dimension_numbers = #tpu.dot_dimension_numbers<[1], [1], [0], [0], [0, 0, 1, 0], [], []>} : vector<32x27xf32>, vector<128x27xf32>, vector<32x128xf32> -> vector<32x128xf32>
    %c0_3 = arith.constant 0 : index
    %c0_4 = arith.constant 0 : index
    %3 = vector.load %arg3[%c0_3, %c0_4] : memref<32x1xf32, #tpu.memory_space<vmem>>, vector<32x1xf32>
    %4 = vector.broadcast %3 : vector<32x1xf32> to vector<32x128xf32>
    %5 = arith.addf %2, %4 : vector<32x128xf32>
    %6 = math.tanh %5 : vector<32x128xf32>
    %c0_5 = arith.constant 0 : index
    %c0_6 = arith.constant 0 : index
    %7 = vector.load %arg4[%c0_5, %c0_6] : memref<32x32xf32, #tpu.memory_space<vmem>>, vector<32x32xf32>
    %cst_7 = arith.constant dense<0.000000e+00> : vector<32x128xf32>
    %8 = tpu.matmul %7, %6, %cst_7 {dimension_numbers = #tpu.dot_dimension_numbers<[1], [0], [0], [1], [0, 0, 1, 1], [], []>} : vector<32x32xf32>, vector<32x128xf32>, vector<32x128xf32> -> vector<32x128xf32>
    %c0_8 = arith.constant 0 : index
    %c0_9 = arith.constant 0 : index
    %9 = vector.load %arg5[%c0_8, %c0_9] : memref<32x1xf32, #tpu.memory_space<vmem>>, vector<32x1xf32>
    %10 = vector.broadcast %9 : vector<32x1xf32> to vector<32x128xf32>
    %11 = arith.addf %8, %10 : vector<32x128xf32>
    %12 = math.tanh %11 : vector<32x128xf32>
    %c0_10 = arith.constant 0 : index
    %c0_11 = arith.constant 0 : index
    %13 = vector.load %arg6[%c0_10, %c0_11] : memref<32x1xf32, #tpu.memory_space<vmem>>, vector<32x1xf32>
    %14 = vector.broadcast %13 : vector<32x1xf32> to vector<32x128xf32>
    %15 = arith.mulf %12, %14 : vector<32x128xf32>
    %cst_12 = arith.constant dense<0.000000e+00> : vector<128xf32>
    %16 = vector.multi_reduction <add>, %15, %cst_12 [0] : vector<32x128xf32> to vector<128xf32>
    %17 = vector.shape_cast %16 : vector<128xf32> to vector<1x128xf32>
    %c0_13 = arith.constant 0 : index
    %18 = memref.load %arg7[%c0_13] : memref<1xf32, #tpu.memory_space<smem>>
    %19 = vector.broadcast %18 : f32 to vector<1x128xf32>
    %20 = arith.addf %17, %19 : vector<1x128xf32>
    %c0_14 = arith.constant 0 : index
    %c0_15 = arith.constant 0 : index
    %21 = vector.load %arg8[%c0_14, %c0_15] : memref<1x128xf32, #tpu.memory_space<vmem>>, vector<1x128xf32>
    tpu.vector_store %arg8[%c0_14, %c0_15], %20 {strides = array<i32>} : memref<1x128xf32, #tpu.memory_space<vmem>>, vector<1x128xf32>,
    return
  }
  func.func @transform_0(%arg0: i32) -> (i32, i32) {
    %c0_i32 = arith.constant 0 : i32
    %c0_i32_0 = arith.constant 0 : i32
    return %arg0, %c0_i32 : i32, i32
  }
  func.func @transform_1(%arg0: i32) -> (i32, i32) {
    %c0_i32 = arith.constant 0 : i32
    %c0_i32_0 = arith.constant 0 : i32
    %c0_i32_1 = arith.constant 0 : i32
    return %c0_i32, %c0_i32_0 : i32, i32
  }
  func.func @transform_2(%arg0: i32) -> (i32, i32) {
    %c0_i32 = arith.constant 0 : i32
    %c0_i32_0 = arith.constant 0 : i32
    %c0_i32_1 = arith.constant 0 : i32
    return %c0_i32, %c0_i32_0 : i32, i32
  }
  func.func @transform_3(%arg0: i32) -> (i32, i32) {
    %c0_i32 = arith.constant 0 : i32
    %c0_i32_0 = arith.constant 0 : i32
    %c0_i32_1 = arith.constant 0 : i32
    return %c0_i32, %c0_i32_0 : i32, i32
  }
  func.func @transform_4(%arg0: i32) -> (i32, i32) {
    %c0_i32 = arith.constant 0 : i32
    %c0_i32_0 = arith.constant 0 : i32
    %c0_i32_1 = arith.constant 0 : i32
    return %c0_i32, %c0_i32_0 : i32, i32
  }
  func.func @transform_5(%arg0: i32) -> (i32, i32) {
    %c0_i32 = arith.constant 0 : i32
    %c0_i32_0 = arith.constant 0 : i32
    %c0_i32_1 = arith.constant 0 : i32
    return %c0_i32, %c0_i32_0 : i32, i32
  }
  func.func @transform_6(%arg0: i32) -> i32 {
    %c0_i32 = arith.constant 0 : i32
    %c0_i32_0 = arith.constant 0 : i32
    return %c0_i32 : i32
  }
  func.func @transform_7(%arg0: i32) -> (i32, i32) {
    %c0_i32 = arith.constant 0 : i32
    %c0_i32_0 = arith.constant 0 : i32
    return %c0_i32, %arg0 : i32, i32
  }
}

</mosaic_0001>

<bundles_post_ra>
// kernel: tpu_custom_call.1
= control target key start
LH: loop header
LB: loop body
LE: loop exit
PB: predicated region body
PF: predicated region fallthrough
CT: control target
= control target key end

     0   :  { %vm72_vm0 = vcmask 220160   ;;  %v611_v6 = vmov 0   ;;  %s822_s0 = inlined_call_operand.vmem [shape: f32[128,27], index: 0, kind: input, shape index: {}]   ;;  %s823_s1 = inlined_call_operand.vmem [shape: f32[32,27], index: 1, kind: input, shape index: {}]   ;;  %s824_s2 = inlined_call_operand.vmem [shape: f32[32,1], index: 2, kind: input, shape index: {}]   ;;  %s825_s3 = inlined_call_operand.vmem [shape: f32[32,32], index: 3, kind: input, shape index: {}]   ;;  %s826_s4 = inlined_call_operand.vmem [shape: f32[32,1], index: 4, kind: input, shape index: {}]   ;;  %s827_s5 = inlined_call_operand.vmem [shape: f32[32,1], index: 5, kind: input, shape index: {}]   ;;  %s828_s6 = inlined_call_operand.<no memory space> [shape: f32[1], index: 6, kind: input, shape index: {}]   ;;  %s829_s7 = inlined_call_operand.hbm [shape: f32[1,128], index: 7, kind: output, shape index: {}]  }
   0x1   :  { %v28_v0 = vld [vmem:[%s822_s0] sm:$0xff]  ;;  %v29_v1 = vld [vmem:[%s822_s0 + $0x8] sm:$0xff]  ;;  %v30_v2 = vld [vmem:[%s822_s0 + $0x10] sm:$0xff]  ;;  %569 = vset.pattern.permute.xlu0 %v611_v6  ;;  %570 = vset.pattern.permute.xlu1 %v611_v6 }
   0x2   :  { %v511_v3 = vpack.c.bf16 %v29_v1, %v28_v0  ;;  %vm664_vm1 = vmpackc.low %vm72_vm0, %vm72_vm0  ;;  %v31_v5 = vld [vmem:[%s822_s0 + $0x18] sm:$0xff]  ;;  %v44_v8 = vld [vmem:[%s823_s1] sm:$0xff] }
   0x3   :  { %v517_v7 = vpack.c.bf16 %v31_v5, %v30_v2  ;;  %v32_v9 = vld [vmem:[%s822_s0 + $0x20] sm:$0xff]  ;;  %v33_v10 = vld [vmem:[%s822_s0 + $0x28] sm:$0xff]  ;;  %491 = vmatprep.mubr.msk.f32.mxu0 %vm72_vm0, %v44_v8  ;;  %v50_v12 = vld [vmem:[%s824_s2 + $0x10] sm:$0xff] }
   0x4   :  { %513 = vmatprep.subr.msk.bf16.mxu0 %vm664_vm1, %v511_v3  ;;  %v48_v11 = vld [vmem:[%s824_s2] sm:$0xff]  ;;  %64 = vperm.xlu1 %570, %v50_v12   ;;  %v523_v13 = vpack.c.bf16 %v33_v10, %v32_v9  ;;  %v49_v14 = vld [vmem:[%s824_s2 + $0x8] sm:$0xff]  ;;  %v51_v15 = vld [vmem:[%s824_s2 + $0x18] sm:$0xff] }
   0x5   :  { %516 = vmatpush3.bf16.xpose.msk.msra.mxu0 %vm664_vm1, %v511_v3  ;;  %54 = vperm.xlu0 %569, %v48_v11  }
   0x6   :  { %519 = vmatprep.subr.msk.bf16.mxu0 %vm664_vm1, %v517_v7 }
   0x7   :  { %13 = vsyncpa [#allocation4], 0  ;;  %v226_v16 = vld [vmem:[%s826_s4] sm:$0xff]  ;;  %v34_v17 = vld [vmem:[%s822_s0 + $0x30] sm:$0xff]  ;;  %vm250_vm2 = vcmask 261120   ;;  %s612_s21 = smov [#allocation3]  }
   0x8   :  { %69 = vperm.xlu1 %570, %v51_v15   ;;  %v35_v18 = vld [vmem:[%s822_s0 + $0x38] sm:$0xff]  ;;  %v227_v19 = vld [vmem:[%s826_s4 + $0x8] sm:$0xff]  ;;  %v228_v21 = vld [vmem:[%s826_s4 + $0x10] sm:$0xff]  ;;  %s399_s22 = sshll.u32 %s612_s21, 4  ;;  %s400_s22 = int_to_ptr.vmem [resolvable:$true] %s399_s22 }
   0x9   :  { %59 = vperm.xlu0 %569, %v49_v14   ;;  %v529_v20 = vpack.c.bf16 %v35_v18, %v34_v17  ;;  %v229_v22 = vld [vmem:[%s826_s4 + $0x18] sm:$0xff]  ;;  %v352_v23 = vld [vmem:[%s827_s5] sm:$0xff]  ;;  %v37_v25 = vld [vmem:[%s822_s0 + $0x48] sm:$0xff]  ;;  %s587_s23 = scalar_lea.vmem %s400_s22, 16  ;;  %s591_s24 = scalar_lea.vmem %s400_s22, 32 }
   0xa   :  { %v36_v24 = vld [vmem:[%s822_s0 + $0x40] sm:$0xff]  ;;  %v353_v26 = vld [vmem:[%s827_s5 + $0x8] sm:$0xff]  ;;  %v354_v28 = vld [vmem:[%s827_s5 + $0x10] sm:$0xff]  ;;  %p588_p0 = scmp.ne.s32.totalorder %s400_s22, %s587_s23  ;;  %p592_p1 = scmp.lt.s32.totalorder %s400_s22, %s400_s22 }
   0xb   :  { %v535_v27 = vpack.c.bf16 %v37_v25, %v36_v24  ;;  %v355_v29 = vld [vmem:[%s827_s5 + $0x18] sm:$0xff]  ;;  %v38_v30 = vld [vmem:[%s822_s0 + $0x50] sm:$0xff]  ;;  %v40_v33 = vld [vmem:[%s822_s0 + $0x60] sm:$0xff]  ;;  %p593_p2 = scmp.lt.s32.totalorder %s591_s24, %s587_s23 }
   0xc   :  { %237 = vperm.xlu1 %570, %v227_v19   ;;  %v39_v31 = vld [vmem:[%s822_s0 + $0x58] sm:$0xff]  ;;  %v41_v34 = vld [vmem:[%s822_s0 + $0x68] sm:$0xff]  ;;  %v42_v36 = vld [vmem:[%s822_s0 + $0x70] sm:$0xff] }
   0xd   :  { %522 = vmatpush3.bf16.xpose.msk.msra.mxu0 %vm664_vm1, %v517_v7  ;;  %232 = vperm.xlu0 %569, %v226_v16   ;;  %v541_v32 = vpack.c.bf16 %v39_v31, %v38_v30  ;;  %v547_v35 = vpack.c.bf16 %v41_v34, %v40_v33  ;;  %v43_v37 = vld [vmem:[%s822_s0 + $0x78] sm:$0xff]  ;;  %v45_v39 = vld [vmem:[%s823_s1 + $0x8] sm:$0xff]  ;;  %v46_v40 = vld [vmem:[%s823_s1 + $0x10] sm:$0xff]  ;;  %p594_p3 = por %p593_p2, %p592_p1 }
   0xe   :  { %525 = vmatprep.subr.msk.bf16.mxu0 %vm664_vm1, %v523_v13  ;;  %v553_v38 = vpack.c.bf16 %v43_v37, %v42_v36  ;;  %v47_v41 = vld [vmem:[%s823_s1 + $0x18] sm:$0xff]  ;;  %v222_v42 = vld [vmem:[%s825_s3] sm:$0xff]  ;;  %v223_v61 = vld [vmem:[%s825_s3 + $0x8] sm:$0xff] }
   0xf   :  { %505 = vmatprep.mubr.msk.f32.mxu1 %vm250_vm2, %v222_v42  ;;  %v224_v62 = vld [vmem:[%s825_s3 + $0x10] sm:$0xff]  ;;  %v225_v63 = vld [vmem:[%s825_s3 + $0x18] sm:$0xff]  ;;  %p595_p4 = pnand %p594_p3, %p588_p0 }
  0x10   :  { %247 = vperm.xlu1 %570, %v229_v22  }
  0x11   :  { %242 = vperm.xlu0 %569, %v228_v21  }
  0x14   :  { %363 = vperm.xlu1 %570, %v353_v26  }
  0x15   :  { %528 = vmatpush3.bf16.xpose.msk.msra.mxu0 %vm664_vm1, %v523_v13  ;;  %358 = vperm.xlu0 %569, %v352_v23  }
  0x16   :  { %531 = vmatprep.subr.msk.bf16.mxu0 %vm664_vm1, %v529_v20 }
  0x18   :  { %373 = vperm.xlu1 %570, %v355_v29  }
  0x19   :  { %368 = vperm.xlu0 %569, %v354_v28  }
  0x1d   :  { %534 = vmatpush3.bf16.xpose.msk.msra.mxu0 %vm664_vm1, %v529_v20 }
  0x1e   :  { %537 = vmatprep.subr.msk.bf16.mxu0 %vm664_vm1, %v535_v27 }
  0x25   :  { %540 = vmatpush3.bf16.xpose.msk.msra.mxu0 %vm664_vm1, %v535_v27 }
  0x26   :  { %543 = vmatprep.subr.msk.bf16.mxu0 %vm664_vm1, %v541_v32 }
  0x2d   :  { %546 = vmatpush3.bf16.xpose.msk.msra.mxu0 %vm664_vm1, %v541_v32  ;;  %v390_v32 = vstv %s828_s6 }
  0x2e   :  { %549 = vmatprep.subr.msk.bf16.mxu0 %vm664_vm1, %v547_v35 }
  0x35   :  { %552 = vmatpush3.bf16.xpose.msk.msra.mxu0 %vm664_vm1, %v547_v35 }
  0x36   :  { %555 = vmatprep.subr.msk.bf16.mxu0 %vm664_vm1, %v553_v38 }
  0x3d   :  { %558 = vmatpush3.bf16.xpose.msk.msra.mxu0 %vm664_vm1, %v553_v38 }
  0x44   :  { %492 = vmatmul.mubr.msk.f32.vlgmr.msra.gmra.mrb[0].mxu0 %vm72_vm0, %v45_v39 }
  0x45   :  { %494 = vmatprep.mubr.msk.f32.mxu0 %vm72_vm0, %v46_v40 }
  0x48   :  { %495 = vmatmul.mubr.msk.f32.gmra.mrb[2].mxu0 %vm72_vm0, %v47_v41 }
  0x83   :  { %v65_v44 = vpop.permute.xlu1 %64 }
  0x84   :  { %v55_v43 = vpop.permute.xlu0 %54 }
  0x87   :  { %v70_v50 = vpop.permute.xlu1 %69 }
  0x88   :  { %v60_v45 = vpop.permute.xlu0 %59 }
  0x8b   :  { %v238_v0 = vpop.permute.xlu1 %237 }
  0x8c   :  { %v233_v1 = vpop.permute.xlu0 %232 }
  0x8f   :  { %v248_v6 = vpop.permute.xlu1 %247 }
  0x90   :  { %v243_v8 = vpop.permute.xlu0 %242 }
  0x93   :  { %v364_v14 = vpop.permute.xlu1 %363 }
  0x94   :  { %v359_v12 = vpop.permute.xlu0 %358 }
  0x97   :  { %v374_v23 = vpop.permute.xlu1 %373 }
  0x98   :  { %v369_v21 = vpop.permute.xlu0 %368 }
 0x117   :  { %v493_v46 = vpop.f32.mrb[0].mxu0 }
 0x118   :  { %v205_v47 = vadd.f32 %v493_v46, %v60_v45  ;;  %v199_v48 = vpop.f32.mrb[1].mxu0 }
 0x119   :  { %v200_v49 = vadd.f32 %v199_v48, %v55_v43 }
 0x11a   :  { %571 = vtanh.f32 %v205_v47 }
 0x11b   :  { %573 = vtanh.f32 %v200_v49  ;;  %v496_v51 = vpop.f32.mrb[2].mxu0 }
 0x11c   :  { %v215_v52 = vadd.f32 %v496_v51, %v70_v50  ;;  %v209_v53 = vpop.f32.mrb[3].mxu0 }
 0x11d   :  { %v210_v54 = vadd.f32 %v209_v53, %v65_v44 }
 0x11e   :  { %575 = vtanh.f32 %v215_v52 }
 0x11f   :  { %577 = vtanh.f32 %v210_v54 }
 0x124   :  { %v572_v55 = vpop.eup %571 }
 0x125   :  { %v574_v56 = vpop.eup %573 }
 0x126   :  { %v559_v57 = vpack.c.bf16 %v572_v55, %v574_v56 }
 0x128   :  { %v576_v58 = vpop.eup %575  ;;  %560 = vmatprep.subr.bf16.mxu1 %v559_v57 }
 0x129   :  { %v578_v59 = vpop.eup %577  ;;  %562 = vmatpush3.bf16.msra.mxu1 %v559_v57 }
 0x12a   :  { %v563_v60 = vpack.c.bf16 %v576_v58, %v578_v59 }
 0x12c   :  { %564 = vmatprep.subr.bf16.mxu1 %v563_v60 }
 0x12d   :  { %566 = vmatpush3.bf16.msra.mxu1 %v563_v60 }
 0x130   :  { %506 = vmatmul.mubr.msk.f32.vlgmr.msra.gmra.mrb[0].mxu1 %vm250_vm2, %v223_v61 }
 0x131   :  { %508 = vmatprep.mubr.msk.f32.mxu1 %vm250_vm2, %v224_v62 }
 0x134   :  { %509 = vmatmul.mubr.msk.f32.gmra.mrb[2].mxu1 %vm250_vm2, %v225_v63 }
 0x203   :  { %v507_v2 = vpop.f32.mrb[0].mxu1 }
 0x204   :  { %v335_v3 = vadd.f32 %v507_v2, %v238_v0  ;;  %v329_v4 = vpop.f32.mrb[1].mxu1 }
 0x205   :  { %v330_v5 = vadd.f32 %v329_v4, %v233_v1 }
 0x206   :  { %579 = vtanh.f32 %v335_v3 }
 0x207   :  { %581 = vtanh.f32 %v330_v5  ;;  %v510_v7 = vpop.f32.mrb[2].mxu1 }
 0x208   :  { %v345_v9 = vadd.f32 %v510_v7, %v248_v6  ;;  %v339_v10 = vpop.f32.mrb[3].mxu1 }
 0x209   :  { %v340_v11 = vadd.f32 %v339_v10, %v243_v8 }
 0x20a   :  { %583 = vtanh.f32 %v345_v9 }
 0x20b   :  { %585 = vtanh.f32 %v340_v11 }
 0x210   :  { %v580_v13 = vpop.eup %579 }
 0x211   :  { %v582_v15 = vpop.eup %581  ;;  %v377_v16 = vmul.f32 %v580_v13, %v364_v14 }
 0x212   :  { %v376_v17 = vmul.f32 %v582_v15, %v359_v12 }
 0x214   :  { %v584_v18 = vpop.eup %583  ;;  %v380_v19 = vadd.f32 %v377_v16, %v376_v17 }
 0x215   :  { %v586_v20 = vpop.eup %585  ;;  %v379_v24 = vmul.f32 %v584_v18, %v374_v23 }
 0x216   :  { %v378_v22 = vmul.f32 %v586_v20, %v369_v21 }
 0x218   :  { %v381_v25 = vadd.f32 %v380_v19, %v378_v22 }
 0x21a   :  { %v382_v26 = vadd.f32 %v381_v25, %v379_v24 }
 0x21c   :  { %v383_v27 = vrot.slane %v382_v26, 4 }
 0x21e   :  { %v384_v28 = vadd.f32 %v383_v27, %v382_v26 }
 0x220   :  { %v385_v29 = vrot.slane %v384_v28, 2 }
 0x222   :  { %v386_v30 = vadd.f32 %v385_v29, %v384_v28 }
 0x224   :  { %v387_v31 = vrot.slane %v386_v30, 1 }
 0x226   :  { %v388_v33 = vadd.f32 %v387_v31, %v386_v30 }
 0x228   :  { %v391_v34 = vadd.f32 %v390_v32, %v388_v33 }
 0x22a   :  { %392 = vst [vmem:[#allocation3] sm:$0x1] %v391_v34 }
 0x22b   :  { %598 = shalt.err (!%p595_p4)
}
 0x22c   :  { %s599_s26 = scalar_lea.hbm %s829_s7, 16 }
 0x22d   :  { %p600_p5 = scmp.ne.s32.totalorder %s829_s7, %s599_s26  ;;  %p603_p6 = scmp.lt.u32.totalorder %s599_s26, %s829_s7 }
 0x22f   :  { %p605_p7 = pnand %p603_p6, %p600_p5 }
 0x231   :  { %608 = shalt.err (!%p605_p7)
}
 0x232   :  { %402 = dma.vmem_to_hbm [thread:$0]  %s400_s22, 16, %s829_s7, [#allocation4]  }
 0x233   :  { %609 = dma.done.wait [#allocation4], 16  }
 0x234   :  { %610 = vsyncadd [#allocation4], 4294967280 }
 0x235   :  { %406 = vsyncpa [#allocation4], 1 }

</bundles_post_ra>
